<compile_context>
chip_gen: v5e
topology: v5e:2x2
jax: 0.10.0
libtpu: 0.0.40
codegen_flags: <defaults>
</compile_context>

<pallas_src>
from functools import partial

import jax
import jax.numpy as jnp
from jax.experimental import pallas as pl
from jax.experimental.pallas import tpu as pltpu


def _attn_kernel(x_ref, a_ref, wq_ref, wk_ref, wv_ref, wo_ref, o_ref, k_sc, v_sc, *,
                 n_head, qk_size, v_size, scale, causal, block_t):
    tq = pl.program_id(1)          # query-tile index within the current batch row

    x = x_ref[0]                   # (bt, C)
    wq = wq_ref[...]               # (C,  H*Dk)    pre-transposed in the wrapper
    wo = wo_ref[...]               # (H*Dv, d_model)
    cdt = x.dtype                  # MXU input dtype (bf16 inputs -> bf16 MXU); accum is f32

    # K / V projections run ONCE per batch row (first query tile) and stay resident in VMEM
    # scratch for all remaining query tiles of this batch row.
    @pl.when(tq == 0)
    def _():
        a = a_ref[0]               # (TA, CA)
        k_sc[...] = jnp.dot(a, wk_ref[...], preferred_element_type=jnp.float32).astype(cdt)
        v_sc[...] = jnp.dot(a, wv_ref[...], preferred_element_type=jnp.float32).astype(cdt)

    # Fused, lane-dense Q projection (all heads at once). Softmax scale is folded in here —
    # one (bt, H*Dk) multiply instead of H per-head (bt, TA) score scalings.
    q = (jnp.dot(x, wq, preferred_element_type=jnp.float32) * scale).astype(cdt)  # (bt, H*Dk)
    k = k_sc[...]                  # (TA, H*Dk)
    v = v_sc[...]                  # (TA, H*Dv)

    T, TA = q.shape[0], k.shape[0]

    if causal:
        # Built once per grid step, reused by every head. Global query index = tq*bt + local
        # row, so the mask is correct across query tiles. Finite negative avoids NaN on
        # fully-masked rows.
        row = jax.lax.broadcasted_iota(jnp.int32, (T, TA), 0) + tq * block_t
        col = jax.lax.broadcasted_iota(jnp.int32, (T, TA), 1)
        keep = col <= row
        neg = jnp.float32(-1e30)

    contract_last = (((1,), (1,)), ((), ()))   # contract last dims -> no in-kernel transpose
    heads = []
    for h in range(n_head):                    # static Python loop: unrolled, no grid overhead
        qh = q[:, h * qk_size:(h + 1) * qk_size]            # (bt, Dk)
        kh = k[:, h * qk_size:(h + 1) * qk_size]            # (TA, Dk)
        vh = v[:, h * v_size:(h + 1) * v_size]              # (TA, Dv)

        s = jax.lax.dot_general(qh, kh, contract_last,
                                preferred_element_type=jnp.float32)           # (bt, TA) f32
        if causal:
            s = jnp.where(keep, s, neg)

        m = jnp.max(s, axis=-1, keepdims=True)
        p = jnp.exp(s - m)
        l = jnp.sum(p, axis=-1, keepdims=True)              # (bt, 1)

        oh = jnp.dot(p.astype(cdt), vh, preferred_element_type=jnp.float32)   # (bt, Dv)
        # Normalize O (bt, Dv) instead of P (bt, TA). (Exact divide; pl.reciprocal(approx=True)
        # would move this to the EUP at the cost of ~1e-4-level accuracy.)
        heads.append((oh * (1.0 / l)).astype(cdt))

    o_heads = jnp.concatenate(heads, axis=-1)               # (bt, H*Dv)

    # Single fused out_proj matmul: contraction dim = H*Dv, lane-dense d_model output.
    out = jnp.dot(o_heads, wo, preferred_element_type=jnp.float32)            # (bt, d_model)
    o_ref[0] = out.astype(o_ref.dtype)


def attention_forward(x, attn, params, *, n_head, qk_size, v_size, causal=False,
                      compute_dtype=None, block_t=None):
    B, T, C = x.shape
    BA, TA, CA = attn.shape
    H, Dk, Dv = n_head, qk_size, v_size

    wq = params["wq"]     # (H*Dk, C)        torch Linear weight (out, in)
    wkv = params["wkv"]   # (H*(Dk+Dv), CA)
    wo = params["wo"]     # (d_model, H*Dv)
    d_model = wo.shape[0]
    out_dtype = x.dtype

    # Wrapper-side layout plumbing (free): fuse heads and pre-transpose so the kernel does
    # plain (rows x cols) matmuls with lane-dense outputs and never calls `.T`.
    wq_f = wq.T                   # (C,  H*Dk)
    wk_f = wkv[: H * Dk].T        # (CA, H*Dk)
    wv_f = wkv[H * Dk:].T         # (CA, H*Dv)
    wo_f = wo.T                   # (H*Dv, d_model)

    if compute_dtype is not None:   # e.g. jnp.bfloat16 for the v6e/v7x MXU fast path
        x = x.astype(compute_dtype)
        attn = attn.astype(compute_dtype)
        wq_f, wk_f, wv_f, wo_f = (w.astype(compute_dtype)
                                  for w in (wq_f, wk_f, wv_f, wo_f))
    cdt = x.dtype

    # Query-tile size: big lane/sublane-friendly tiles, K/V projected once per batch row.
    if block_t is None:
        block_t = 128 if (T % 128 == 0) else T
    assert T % block_t == 0, "T must be divisible by block_t"
    n_tq = T // block_t

    scale = 1.0 / float(Dk) ** 0.5
    kernel = partial(_attn_kernel, n_head=H, qk_size=Dk, v_size=Dv,
                     scale=scale, causal=causal, block_t=block_t)

    return pl.pallas_call(
        kernel,
        out_shape=jax.ShapeDtypeStruct((B, T, d_model), out_dtype),
        grid_spec=pltpu.PrefetchScalarGridSpec(
            num_scalar_prefetch=0,
            grid=(B, n_tq),       # batch outer (parallel), query tiles inner (arbitrary)
            in_specs=[
                pl.BlockSpec((1, block_t, C), lambda b, t: (b, t, 0)),
                pl.BlockSpec((1, TA, CA), lambda b, t: (b, 0, 0)),       # revisited per tile
                pl.BlockSpec((C, H * Dk), lambda b, t: (0, 0)),          # weights stay resident
                pl.BlockSpec((CA, H * Dk), lambda b, t: (0, 0)),
                pl.BlockSpec((CA, H * Dv), lambda b, t: (0, 0)),
                pl.BlockSpec((H * Dv, d_model), lambda b, t: (0, 0)),
            ],
            out_specs=pl.BlockSpec((1, block_t, d_model), lambda b, t: (b, t, 0)),
            scratch_shapes=[pltpu.VMEM((TA, H * Dk), cdt),   # K, projected once per batch row
                            pltpu.VMEM((TA, H * Dv), cdt)],  # V
        ),
        compiler_params=pltpu.CompilerParams(
            dimension_semantics=("parallel", "arbitrary")),  # batch shards across TCs on v7x
    )(x, attn, wq_f, wk_f, wv_f, wo_f)


def reference_forward(x, attn, params, *, n_head, qk_size, v_size, causal=False):
    """Pure-JAX replica of the PyTorch forward (eval mode)."""
    B, T, C = x.shape
    BA, TA, CA = attn.shape
    H, Dk, Dv = n_head, qk_size, v_size
    q = x @ params["wq"].T
    kv = attn @ params["wkv"].T
    k, v = kv[..., : H * Dk], kv[..., H * Dk:]
    q = q.reshape(B, T, H, Dk).transpose(0, 2, 1, 3)
    k = k.reshape(BA, TA, H, Dk).transpose(0, 2, 1, 3)
    v = v.reshape(BA, TA, H, Dv).transpose(0, 2, 1, 3)
    s = jnp.einsum("bhtd,bhsd->bhts", q, k) / jnp.sqrt(jnp.float32(Dk))
    if causal:
        mask = jnp.tril(jnp.ones((T, TA), dtype=bool))
        s = jnp.where(mask, s, -jnp.inf)
    p = jax.nn.softmax(s, axis=-1)
    o = jnp.einsum("bhts,bhsd->bhtd", p, v)
    o = o.transpose(0, 2, 1, 3).reshape(B, T, H * Dv)
    return o @ params["wo"].T


if __name__ == "__main__":
    # small config (scaled-down Config): d_model=128, n_head=4, qk_size=32, v_size=32
    d_model, n_head, qk_size, v_size = 128, 4, 32, 32
    B, T, TA = 2, 16, 16
    block_t = 8   # forces 2 query tiles -> exercises the K/V-scratch reuse path

    key = jax.random.PRNGKey(0)
    k_x, k_a, k_wq, k_wkv, k_wo = jax.random.split(key, 5)

    x = jax.random.normal(k_x, (B, T, d_model), dtype=jnp.float32)
    attn = jax.random.normal(k_a, (B, TA, d_model), dtype=jnp.float32)

    # deterministic parameter init (torch Linear-style: weight shape (out, in), no bias)
    params = {
        "wq": jax.random.normal(k_wq, (qk_size * n_head, d_model), jnp.float32)
        * (1.0 / d_model ** 0.5),
        "wkv": jax.random.normal(k_wkv, ((qk_size + v_size) * n_head, d_model), jnp.float32)
        * (1.0 / d_model ** 0.5),
        "wo": jax.random.normal(k_wo, (d_model, v_size * n_head), jnp.float32)
        * (1.0 / (v_size * n_head) ** 0.5),
    }

    # 1) f32 cross-attention (encoder style), tight parity with the reference
    out = attention_forward(
        x, attn, params, n_head=n_head, qk_size=qk_size, v_size=v_size, causal=False,
        block_t=block_t,
    )
    out = jax.block_until_ready(out)
    ref = reference_forward(
        x, attn, params, n_head=n_head, qk_size=qk_size, v_size=v_size, causal=False
    )
    assert out.shape == (B, T, d_model)
    assert jnp.allclose(out, ref, atol=1e-4, rtol=1e-4), "mismatch vs JAX reference (f32)"

    # 2) causal self-attention (T == TA) — exercises the mask offset across query tiles
    out_c = attention_forward(
        x, x, params, n_head=n_head, qk_size=qk_size, v_size=v_size, causal=True,
        block_t=block_t,
    )
    out_c = jax.block_until_ready(out_c)
    ref_c = reference_forward(
        x, x, params, n_head=n_head, qk_size=qk_size, v_size=v_size, causal=True
    )
    assert jnp.allclose(out_c, ref_c, atol=1e-4, rtol=1e-4), "mismatch vs JAX reference (causal)"

    # 3) bf16 MXU fast path (v6e/v7x): bf16 MXU inputs, f32 accumulation, f32 output
    out_bf = attention_forward(
        x, attn, params, n_head=n_head, qk_size=qk_size, v_size=v_size, causal=False,
        compute_dtype=jnp.bfloat16, block_t=block_t,
    )
    out_bf = jax.block_until_ready(out_bf)
    assert jnp.allclose(out_bf, ref, atol=1e-1, rtol=1e-1), "mismatch vs JAX reference (bf16)"

    print("KERNEL_OK")
</pallas_src>

<mosaic_0001>
module attributes {stable_mosaic.version = 11 : i64} {
  func.func @_attn_kernel(%arg0: i32, %arg1: i32, %arg2: memref<1x8x128xf32, #tpu.memory_space<vmem>>, %arg3: memref<1x16x128xf32, #tpu.memory_space<vmem>>, %arg4: memref<128x128xf32, #tpu.memory_space<vmem>>, %arg5: memref<128x128xf32, #tpu.memory_space<vmem>>, %arg6: memref<128x128xf32, #tpu.memory_space<vmem>>, %arg7: memref<128x128xf32, #tpu.memory_space<vmem>>, %arg8: memref<1x8x128xf32, #tpu.memory_space<vmem>>, %arg9: memref<16x128xf32, #tpu.memory_space<vmem>>, %arg10: memref<16x128xf32, #tpu.memory_space<vmem>>) attributes {dimension_semantics = [#tpu.dimension_semantics<parallel>, #tpu.dimension_semantics<arbitrary>], iteration_bounds = array<i64: 2, 2>, scalar_prefetch = 0 : i64, scratch_operands = 2 : i64, tpu.core_type = #tpu.core_type<tc>, window_params = [{transform_indices = @transform_0, window_bounds = array<i64: 1, 8, 128>}, {transform_indices = @transform_1, window_bounds = array<i64: 1, 16, 128>}, {pipeline_mode = #tpu.pipeline_mode<synchronous>, transform_indices = @transform_2, window_bounds = array<i64: 128, 128>}, {pipeline_mode = #tpu.pipeline_mode<synchronous>, transform_indices = @transform_3, window_bounds = array<i64: 128, 128>}, {pipeline_mode = #tpu.pipeline_mode<synchronous>, transform_indices = @transform_4, window_bounds = array<i64: 128, 128>}, {pipeline_mode = #tpu.pipeline_mode<synchronous>, transform_indices = @transform_5, window_bounds = array<i64: 128, 128>}, {transform_indices = @transform_6, window_bounds = array<i64: 1, 8, 128>}]} {
    %c0 = arith.constant 0 : index
    %c0_0 = arith.constant 0 : index
    %c0_1 = arith.constant 0 : index
    %0 = vector.load %arg2[%c0, %c0_0, %c0_1] : memref<1x8x128xf32, #tpu.memory_space<vmem>>, vector<1x8x128xf32>
    %1 = vector.shape_cast %0 : vector<1x8x128xf32> to vector<8x128xf32>
    %c0_2 = arith.constant 0 : index
    %c0_3 = arith.constant 0 : index
    %2 = vector.load %arg4[%c0_2, %c0_3] : memref<128x128xf32, #tpu.memory_space<vmem>>, vector<128x128xf32>
    %c0_4 = arith.constant 0 : index
    %c0_5 = arith.constant 0 : index
    %3 = vector.load %arg7[%c0_4, %c0_5] : memref<128x128xf32, #tpu.memory_space<vmem>>, vector<128x128xf32>
    %c0_i32 = arith.constant 0 : i32
    %4 = arith.cmpi eq, %arg1, %c0_i32 : i32
    %5 = arith.extui %4 : i1 to i32
    %c0_i32_6 = arith.constant 0 : i32
    %6 = arith.cmpi ne, %5, %c0_i32_6 : i32
    scf.if %6 {
      %c0_36 = arith.constant 0 : index
      %c0_37 = arith.constant 0 : index
      %c0_38 = arith.constant 0 : index
      %81 = vector.load %arg3[%c0_36, %c0_37, %c0_38] : memref<1x16x128xf32, #tpu.memory_space<vmem>>, vector<1x16x128xf32>
      %82 = vector.shape_cast %81 : vector<1x16x128xf32> to vector<16x128xf32>
      %c0_39 = arith.constant 0 : index
      %c0_40 = arith.constant 0 : index
      %83 = vector.load %arg5[%c0_39, %c0_40] : memref<128x128xf32, #tpu.memory_space<vmem>>, vector<128x128xf32>
      %cst_41 = arith.constant dense<0.000000e+00> : vector<16x128xf32>
      %84 = tpu.matmul %82, %83, %cst_41 {dimension_numbers = #tpu.dot_dimension_numbers<[1], [0], [0], [1], [0, 0, 1, 1], [], []>} : vector<16x128xf32>, vector<128x128xf32>, vector<16x128xf32> -> vector<16x128xf32>
      %c0_42 = arith.constant 0 : index
      %c0_43 = arith.constant 0 : index
      %85 = vector.load %arg9[%c0_42, %c0_43] : memref<16x128xf32, #tpu.memory_space<vmem>>, vector<16x128xf32>
      tpu.vector_store %arg9[%c0_42, %c0_43], %84 {strides = array<i32>} : memref<16x128xf32, #tpu.memory_space<vmem>>, vector<16x128xf32>,
      %c0_44 = arith.constant 0 : index
      %c0_45 = arith.constant 0 : index
      %86 = vector.load %arg6[%c0_44, %c0_45] : memref<128x128xf32, #tpu.memory_space<vmem>>, vector<128x128xf32>
      %cst_46 = arith.constant dense<0.000000e+00> : vector<16x128xf32>
      %87 = tpu.matmul %82, %86, %cst_46 {dimension_numbers = #tpu.dot_dimension_numbers<[1], [0], [0], [1], [0, 0, 1, 1], [], []>} : vector<16x128xf32>, vector<128x128xf32>, vector<16x128xf32> -> vector<16x128xf32>
      %c0_47 = arith.constant 0 : index
      %c0_48 = arith.constant 0 : index
      %88 = vector.load %arg10[%c0_47, %c0_48] : memref<16x128xf32, #tpu.memory_space<vmem>>, vector<16x128xf32>
      tpu.vector_store %arg10[%c0_47, %c0_48], %87 {strides = array<i32>} : memref<16x128xf32, #tpu.memory_space<vmem>>, vector<16x128xf32>,
    } else {
    }
    %cst = arith.constant dense<0.000000e+00> : vector<8x128xf32>
    %7 = tpu.matmul %1, %2, %cst {dimension_numbers = #tpu.dot_dimension_numbers<[1], [0], [0], [1], [0, 0, 1, 1], [], []>} : vector<8x128xf32>, vector<128x128xf32>, vector<8x128xf32> -> vector<8x128xf32>
    %cst_7 = arith.constant 0.176776692 : f32
    %8 = vector.broadcast %cst_7 : f32 to vector<8x128xf32>
    %9 = arith.mulf %7, %8 : vector<8x128xf32>
    %c0_8 = arith.constant 0 : index
    %c0_9 = arith.constant 0 : index
    %10 = vector.load %arg9[%c0_8, %c0_9] : memref<16x128xf32, #tpu.memory_space<vmem>>, vector<16x128xf32>
    %c0_10 = arith.constant 0 : index
    %c0_11 = arith.constant 0 : index
    %11 = vector.load %arg10[%c0_10, %c0_11] : memref<16x128xf32, #tpu.memory_space<vmem>>, vector<16x128xf32>
    %12 = vector.extract_strided_slice %9 {offsets = [0, 0], sizes = [8, 32], strides = [1, 1]} : vector<8x128xf32> to vector<8x32xf32>
    %13 = vector.extract_strided_slice %10 {offsets = [0, 0], sizes = [16, 32], strides = [1, 1]} : vector<16x128xf32> to vector<16x32xf32>
    %14 = vector.extract_strided_slice %11 {offsets = [0, 0], sizes = [16, 32], strides = [1, 1]} : vector<16x128xf32> to vector<16x32xf32>
    %cst_12 = arith.constant dense<0.000000e+00> : vector<8x16xf32>
    %15 = tpu.matmul %12, %13, %cst_12 {dimension_numbers = #tpu.dot_dimension_numbers<[1], [1], [0], [0], [0, 0, 1, 0], [], []>} : vector<8x32xf32>, vector<16x32xf32>, vector<8x16xf32> -> vector<8x16xf32>
    %cst_13 = arith.constant dense<0xFF800000> : vector<8xf32>
    %16 = vector.multi_reduction <maximumf>, %15, %cst_13 [1] : vector<8x16xf32> to vector<8xf32>
    %17 = vector.shape_cast %16 : vector<8xf32> to vector<8x1xf32>
    %18 = vector.broadcast %17 : vector<8x1xf32> to vector<8x16xf32>
    %19 = arith.subf %15, %18 : vector<8x16xf32>
    %20 = math.exp %19 : vector<8x16xf32>
    %cst_14 = arith.constant dense<0.000000e+00> : vector<8xf32>
    %21 = vector.multi_reduction <add>, %20, %cst_14 [1] : vector<8x16xf32> to vector<8xf32>
    %22 = vector.shape_cast %21 : vector<8xf32> to vector<8x1xf32>
    %cst_15 = arith.constant dense<0.000000e+00> : vector<8x32xf32>
    %23 = tpu.matmul %20, %14, %cst_15 {dimension_numbers = #tpu.dot_dimension_numbers<[1], [0], [0], [1], [0, 0, 1, 1], [], []>} : vector<8x16xf32>, vector<16x32xf32>, vector<8x32xf32> -> vector<8x32xf32>
    %cst_16 = arith.constant 1.000000e+00 : f32
    %24 = vector.broadcast %cst_16 : f32 to vector<8x1xf32>
    %25 = arith.divf %24, %22 : vector<8x1xf32>
    %26 = vector.broadcast %25 : vector<8x1xf32> to vector<8x32xf32>
    %27 = arith.mulf %23, %26 : vector<8x32xf32>
    %28 = vector.extract_strided_slice %9 {offsets = [0, 32], sizes = [8, 32], strides = [1, 1]} : vector<8x128xf32> to vector<8x32xf32>
    %29 = vector.extract_strided_slice %10 {offsets = [0, 32], sizes = [16, 32], strides = [1, 1]} : vector<16x128xf32> to vector<16x32xf32>
    %30 = vector.extract_strided_slice %11 {offsets = [0, 32], sizes = [16, 32], strides = [1, 1]} : vector<16x128xf32> to vector<16x32xf32>
    %cst_17 = arith.constant dense<0.000000e+00> : vector<8x16xf32>
    %31 = tpu.matmul %28, %29, %cst_17 {dimension_numbers = #tpu.dot_dimension_numbers<[1], [1], [0], [0], [0, 0, 1, 0], [], []>} : vector<8x32xf32>, vector<16x32xf32>, vector<8x16xf32> -> vector<8x16xf32>
    %cst_18 = arith.constant dense<0xFF800000> : vector<8xf32>
    %32 = vector.multi_reduction <maximumf>, %31, %cst_18 [1] : vector<8x16xf32> to vector<8xf32>
    %33 = vector.shape_cast %32 : vector<8xf32> to vector<8x1xf32>
    %34 = vector.broadcast %33 : vector<8x1xf32> to vector<8x16xf32>
    %35 = arith.subf %31, %34 : vector<8x16xf32>
    %36 = math.exp %35 : vector<8x16xf32>
    %cst_19 = arith.constant dense<0.000000e+00> : vector<8xf32>
    %37 = vector.multi_reduction <add>, %36, %cst_19 [1] : vector<8x16xf32> to vector<8xf32>
    %38 = vector.shape_cast %37 : vector<8xf32> to vector<8x1xf32>
    %cst_20 = arith.constant dense<0.000000e+00> : vector<8x32xf32>
    %39 = tpu.matmul %36, %30, %cst_20 {dimension_numbers = #tpu.dot_dimension_numbers<[1], [0], [0], [1], [0, 0, 1, 1], [], []>} : vector<8x16xf32>, vector<16x32xf32>, vector<8x32xf32> -> vector<8x32xf32>
    %cst_21 = arith.constant 1.000000e+00 : f32
    %40 = vector.broadcast %cst_21 : f32 to vector<8x1xf32>
    %41 = arith.divf %40, %38 : vector<8x1xf32>
    %42 = vector.broadcast %41 : vector<8x1xf32> to vector<8x32xf32>
    %43 = arith.mulf %39, %42 : vector<8x32xf32>
    %44 = vector.extract_strided_slice %9 {offsets = [0, 64], sizes = [8, 32], strides = [1, 1]} : vector<8x128xf32> to vector<8x32xf32>
    %45 = vector.extract_strided_slice %10 {offsets = [0, 64], sizes = [16, 32], strides = [1, 1]} : vector<16x128xf32> to vector<16x32xf32>
    %46 = vector.extract_strided_slice %11 {offsets = [0, 64], sizes = [16, 32], strides = [1, 1]} : vector<16x128xf32> to vector<16x32xf32>
    %cst_22 = arith.constant dense<0.000000e+00> : vector<8x16xf32>
    %47 = tpu.matmul %44, %45, %cst_22 {dimension_numbers = #tpu.dot_dimension_numbers<[1], [1], [0], [0], [0, 0, 1, 0], [], []>} : vector<8x32xf32>, vector<16x32xf32>, vector<8x16xf32> -> vector<8x16xf32>
    %cst_23 = arith.constant dense<0xFF800000> : vector<8xf32>
    %48 = vector.multi_reduction <maximumf>, %47, %cst_23 [1] : vector<8x16xf32> to vector<8xf32>
    %49 = vector.shape_cast %48 : vector<8xf32> to vector<8x1xf32>
    %50 = vector.broadcast %49 : vector<8x1xf32> to vector<8x16xf32>
    %51 = arith.subf %47, %50 : vector<8x16xf32>
    %52 = math.exp %51 : vector<8x16xf32>
    %cst_24 = arith.constant dense<0.000000e+00> : vector<8xf32>
    %53 = vector.multi_reduction <add>, %52, %cst_24 [1] : vector<8x16xf32> to vector<8xf32>
    %54 = vector.shape_cast %53 : vector<8xf32> to vector<8x1xf32>
    %cst_25 = arith.constant dense<0.000000e+00> : vector<8x32xf32>
    %55 = tpu.matmul %52, %46, %cst_25 {dimension_numbers = #tpu.dot_dimension_numbers<[1], [0], [0], [1], [0, 0, 1, 1], [], []>} : vector<8x16xf32>, vector<16x32xf32>, vector<8x32xf32> -> vector<8x32xf32>
    %cst_26 = arith.constant 1.000000e+00 : f32
    %56 = vector.broadcast %cst_26 : f32 to vector<8x1xf32>
    %57 = arith.divf %56, %54 : vector<8x1xf32>
    %58 = vector.broadcast %57 : vector<8x1xf32> to vector<8x32xf32>
    %59 = arith.mulf %55, %58 : vector<8x32xf32>
    %60 = vector.extract_strided_slice %9 {offsets = [0, 96], sizes = [8, 32], strides = [1, 1]} : vector<8x128xf32> to vector<8x32xf32>
    %61 = vector.extract_strided_slice %10 {offsets = [0, 96], sizes = [16, 32], strides = [1, 1]} : vector<16x128xf32> to vector<16x32xf32>
    %62 = vector.extract_strided_slice %11 {offsets = [0, 96], sizes = [16, 32], strides = [1, 1]} : vector<16x128xf32> to vector<16x32xf32>
    %cst_27 = arith.constant dense<0.000000e+00> : vector<8x16xf32>
    %63 = tpu.matmul %60, %61, %cst_27 {dimension_numbers = #tpu.dot_dimension_numbers<[1], [1], [0], [0], [0, 0, 1, 0], [], []>} : vector<8x32xf32>, vector<16x32xf32>, vector<8x16xf32> -> vector<8x16xf32>
    %cst_28 = arith.constant dense<0xFF800000> : vector<8xf32>
    %64 = vector.multi_reduction <maximumf>, %63, %cst_28 [1] : vector<8x16xf32> to vector<8xf32>
    %65 = vector.shape_cast %64 : vector<8xf32> to vector<8x1xf32>
    %66 = vector.broadcast %65 : vector<8x1xf32> to vector<8x16xf32>
    %67 = arith.subf %63, %66 : vector<8x16xf32>
    %68 = math.exp %67 : vector<8x16xf32>
    %cst_29 = arith.constant dense<0.000000e+00> : vector<8xf32>
    %69 = vector.multi_reduction <add>, %68, %cst_29 [1] : vector<8x16xf32> to vector<8xf32>
    %70 = vector.shape_cast %69 : vector<8xf32> to vector<8x1xf32>
    %cst_30 = arith.constant dense<0.000000e+00> : vector<8x32xf32>
    %71 = tpu.matmul %68, %62, %cst_30 {dimension_numbers = #tpu.dot_dimension_numbers<[1], [0], [0], [1], [0, 0, 1, 1], [], []>} : vector<8x16xf32>, vector<16x32xf32>, vector<8x32xf32> -> vector<8x32xf32>
    %cst_31 = arith.constant 1.000000e+00 : f32
    %72 = vector.broadcast %cst_31 : f32 to vector<8x1xf32>
    %73 = arith.divf %72, %70 : vector<8x1xf32>
    %74 = vector.broadcast %73 : vector<8x1xf32> to vector<8x32xf32>
    %75 = arith.mulf %71, %74 : vector<8x32xf32>
    %76 = tpu.concatenate %27, %43, %59, %75 in 1 : vector<8x32xf32>, vector<8x32xf32>, vector<8x32xf32>, vector<8x32xf32> -> vector<8x128xf32>
    %cst_32 = arith.constant dense<0.000000e+00> : vector<8x128xf32>
    %77 = tpu.matmul %76, %3, %cst_32 {dimension_numbers = #tpu.dot_dimension_numbers<[1], [0], [0], [1], [0, 0, 1, 1], [], []>} : vector<8x128xf32>, vector<128x128xf32>, vector<8x128xf32> -> vector<8x128xf32>
    %c0_33 = arith.constant 0 : index
    %c0_34 = arith.constant 0 : index
    %c0_35 = arith.constant 0 : index
    %78 = vector.load %arg8[%c0_33, %c0_34, %c0_35] : memref<1x8x128xf32, #tpu.memory_space<vmem>>, vector<1x8x128xf32>
    %79 = vector.shape_cast %78 : vector<1x8x128xf32> to vector<8x128xf32>
    %80 = vector.shape_cast %77 : vector<8x128xf32> to vector<1x8x128xf32>
    tpu.vector_store %arg8[%c0_33, %c0_34, %c0_35], %80 {strides = array<i32>} : memref<1x8x128xf32, #tpu.memory_space<vmem>>, vector<1x8x128xf32>,
    return
  }
  func.func @transform_0(%arg0: i32, %arg1: i32) -> (i32, i32, i32) {
    %c0_i32 = arith.constant 0 : i32
    %c0_i32_0 = arith.constant 0 : i32
    return %arg0, %arg1, %c0_i32 : i32, i32, i32
  }
  func.func @transform_1(%arg0: i32, %arg1: i32) -> (i32, i32, i32) {
    %c0_i32 = arith.constant 0 : i32
    %c0_i32_0 = arith.constant 0 : i32
    %c0_i32_1 = arith.constant 0 : i32
    return %arg0, %c0_i32, %c0_i32_0 : i32, i32, i32
  }
  func.func @transform_2(%arg0: i32, %arg1: i32) -> (i32, i32) {
    %c0_i32 = arith.constant 0 : i32
    %c0_i32_0 = arith.constant 0 : i32
    %c0_i32_1 = arith.constant 0 : i32
    return %c0_i32, %c0_i32_0 : i32, i32
  }
  func.func @transform_3(%arg0: i32, %arg1: i32) -> (i32, i32) {
    %c0_i32 = arith.constant 0 : i32
    %c0_i32_0 = arith.constant 0 : i32
    %c0_i32_1 = arith.constant 0 : i32
    return %c0_i32, %c0_i32_0 : i32, i32
  }
  func.func @transform_4(%arg0: i32, %arg1: i32) -> (i32, i32) {
    %c0_i32 = arith.constant 0 : i32
    %c0_i32_0 = arith.constant 0 : i32
    %c0_i32_1 = arith.constant 0 : i32
    return %c0_i32, %c0_i32_0 : i32, i32
  }
  func.func @transform_5(%arg0: i32, %arg1: i32) -> (i32, i32) {
    %c0_i32 = arith.constant 0 : i32
    %c0_i32_0 = arith.constant 0 : i32
    %c0_i32_1 = arith.constant 0 : i32
    return %c0_i32, %c0_i32_0 : i32, i32
  }
  func.func @transform_6(%arg0: i32, %arg1: i32) -> (i32, i32, i32) {
    %c0_i32 = arith.constant 0 : i32
    %c0_i32_0 = arith.constant 0 : i32
    return %arg0, %arg1, %c0_i32 : i32, i32, i32
  }
}

</mosaic_0001>

<bundles_post_ra>
// kernel: tpu_custom_call.1
= control target key start
LH: loop header
LB: loop body
LE: loop exit
PB: predicated region body
PF: predicated region fallthrough
CT: control target
= control target key end

     0   :  { %s2160_s0 = inlined_call_operand.hbm [shape: f32[2,16,128], index: 0, kind: input, shape index: {}]   ;;  %s2161_s1 = inlined_call_operand.hbm [shape: f32[2,16,128], index: 1, kind: input, shape index: {}]   ;;  %s2162_s2 = inlined_call_operand.hbm [shape: f32[128,128], index: 2, kind: input, shape index: {}]   ;;  %s2163_s3 = inlined_call_operand.hbm [shape: f32[128,128], index: 3, kind: input, shape index: {}]   ;;  %s2164_s4 = inlined_call_operand.hbm [shape: f32[128,128], index: 4, kind: input, shape index: {}]   ;;  %s2165_s5 = inlined_call_operand.hbm [shape: f32[128,128], index: 5, kind: input, shape index: {}]   ;;  %s2166_s6 = inlined_call_operand.hbm [shape: f32[2,16,128], index: 6, kind: output, shape index: {}]  }
   0x1   :  { %2178 = sst [smem:[#allocation30_spill]] %s2160_s0 }
   0x2   :  { %2179 = sst [smem:[#allocation31_spill]] %s2162_s2 }
   0x3   :  { %2180 = sst [smem:[#allocation32_spill]] %s2163_s3 }
   0x4   :  { %2181 = sst [smem:[#allocation33_spill]] %s2164_s4 }
   0x5   :  { %2182 = sst [smem:[#allocation34_spill]] %s2165_s5 }
   0x6   :  { %2183 = sst [smem:[#allocation35_spill]] %s2166_s6 }
   0x7   :  { %11 = vsyncpa [#allocation5], 0 }
   0x8   :  { %13 = vsyncpa [#allocation5 + $0x1], 0 }
   0x9   :  { %14 = vsyncpa [#allocation8], 0 }
   0xa   :  { %16 = vsyncpa [#allocation8 + $0x1], 0 }
   0xb   :  { %17 = vsyncpa [#allocation11], 0 }
   0xc   :  { %18 = vsyncpa [#allocation14], 0 }
   0xd   :  { %19 = vsyncpa [#allocation6], 0 }
   0xe   :  { %21 = vsyncpa [#allocation6 + $0x1], 0  ;;  %s1707_s21 = smov 0   ;;  %s1709_s22 = smov 0  }
   0xf   :  { %s1711_s23 = smov 0   ;;  %s1713_s24 = smov 0  }
  0x10   :  { %s1715_s25 = smov 0   ;;  %s1717_s26 = smov 0  }
  0x11   :  { %s1719_s27 = smov 0   ;;  %s1721_s28 = smov 0  }
  0x12   :  { %s1723_s29 = smov 0   ;;  %s1725_s30 = smov 0  }
  0x13   :  { %s1727_s7 = smov 0  }
  0x14 LB: > { %2184 = sst [smem:[#allocation22_spill]] %s1633_s24  ;;  %s1763_s8 = sadd.s32 4294967295, %s1661_s7   ;;  %s1661_s7 = sphi %s1727_s7, %s27_s7   ;;  %s1657_s30 = sphi %s1725_s30, %s2225_s30   ;;  %s1653_s29 = sphi %s1723_s29, %s2217_s29   ;;  %s1649_s28 = sphi %s1721_s28, %s2224_s28   ;;  %s1645_s27 = sphi %s1719_s27, %s2216_s27   ;;  %s1641_s26 = sphi %s1717_s26, %s2215_s26   ;;  %s1637_s25 = sphi %s1715_s25, %s2223_s25   ;;  %s1633_s24 = sphi %s1713_s24, %s2222_s24   ;;  %s1629_s23 = sphi %s1711_s23, %s2221_s23   ;;  %s1625_s22 = sphi %s1709_s22, %s2220_s22   ;;  %s1621_s21 = sphi %s1707_s21, %s2219_s21  }
  0x15   : > { %2185 = sst [smem:[#allocation23_spill]] %s1641_s26  ;;  %p1084_p0 = scmp.ge.s32.totalorder %s1661_s7, 1 }
  0x16   : > { %2186 = sst [smem:[#allocation24_spill]] %s1653_s29  ;;  %p62_p1 = scmp.eq.s32.totalorder %s1763_s8, 0 }
  0x17   : > { %p210_p2 = scmp.lt.s32.totalorder %s1661_s7, 5  ;;  %s2187_s2 = sld [smem:[#allocation31_spill]] }
  0x18   : > { %s1663_s13 = smov [#allocation9]   ;;  %s2190_s3 = sld [smem:[#allocation32_spill]] }
  0x19   : > { %p1771_p3 = pnand %p1084_p0, %p210_p2  ;;  %s223_s14 = sshll.u32 %s1663_s13, 4  ;;  %s224_s14 = int_to_ptr.vmem [resolvable:$true] %s223_s14 }
  0x1a   : > { %s2167_s19 = smov 128   ;;  %s2168_s20 = smov 8  }
  0x1b   : > { %p1181_p4 = pneg %p1771_p3  ;;  %s1666_s9 = smov [#allocation10]  }
  0x1c   : > { %s237_s10 = sshll.u32 %s1666_s9, 4  ;;  %s2191_s4 = sld [smem:[#allocation33_spill]]  ;;  %s238_s10 = int_to_ptr.vmem [resolvable:$true] %s237_s10 }
  0x1d   : > { %s221_s11 = sshll.u32 %s2187_s2, 4  ;;  %p1779_p5 = pnand %p1181_p4, %p62_p1  ;;  %s222_s11 = int_to_ptr.hbm [resolvable:$true] %s221_s11 }
  0x1e   : > { %s235_s18 = sshll.u32 %s2190_s3, 4  ;;  %s2192_s5 = sld [smem:[#allocation34_spill]]  ;;  %s236_s18 = int_to_ptr.hbm [resolvable:$true] %s235_s18 }
  0x1f   : > { %1184 = dma.hbm_to_vmem [thread:$0]  (!%p1779_p5), %s222_s11, 2048, %s224_s14, [#allocation8], %s2167_s19, %s2167_s19, %s2168_s20  }
  0x20   : > { %1187 = dma.hbm_to_vmem [thread:$0]  (!%p1779_p5), %s236_s18, 2048, %s238_s10, [#allocation11], %s2167_s19, %s2167_s19, %s2168_s20  }
  0x21   : > { %s1667_s9 = smov [#allocation12]   ;;  %s1668_s18 = smov [#allocation13]  }
  0x22   : > { %s249_s16 = sshll.u32 %s2191_s4, 4  ;;  %s251_s2 = sshll.u32 %s1667_s9, 4  ;;  %s250_s16 = int_to_ptr.hbm [resolvable:$true] %s249_s16  ;;  %s252_s2 = int_to_ptr.vmem [resolvable:$true] %s251_s2 }
  0x23   : > { %1190 = dma.hbm_to_vmem [thread:$0]  (!%p1779_p5), %s250_s16, 2048, %s252_s2, [#allocation11], %s2167_s19, %s2167_s19, %s2168_s20  }
  0x24   : > { %s263_s14 = sshll.u32 %s2192_s5, 4  ;;  %s265_s10 = sshll.u32 %s1668_s18, 4  ;;  %s264_s14 = int_to_ptr.hbm [resolvable:$true] %s263_s14  ;;  %s266_s10 = int_to_ptr.vmem [resolvable:$true] %s265_s10 }
  0x25   : > { %1193 = dma.hbm_to_vmem [thread:$0]  (!%p1779_p5), %s264_s14, 2048, %s266_s10, [#allocation14], %s2167_s19, %s2167_s19, %s2168_s20  }
  0x26   : > { %s1083_s13 = sadd.s32 4294967294, %s1661_s7   ;;  %s36_s16 = sadd.s32 1, %s1653_s29 }
  0x27   : > { %p37_p6 = scmp.ge.s32.totalorder %s36_s16, 2  ;;  %s39_s17 = sadd.s32 1, %s1657_s30 }
  0x28   : > { %s48_s11 = sadd.s32 1, %s1641_s26  ;;  %p2170_p7 = scmp.ne.s32.totalorder %s1641_s26, %s1637_s25 }
  0x29   : > { %s2227_s16 = smov (%p37_p6, %s36_s16), 0  ;;  %s2229_s17 = smov (!%p37_p6, %s39_s17), %s1657_s30 }
  0x2a   : > { %2193 = sst [smem:[#allocation25_spill]] %s2227_s16  ;;  %s44_s15 = ssub.s32 %s1653_s29, %s2227_s16 }
  0x2b   : > { %p56_p8 = scmp.eq.s32.totalorder %s1661_s7, 0  ;;  %p41_p9 = scmp.ge.s32.totalorder %s2229_s17, 2 }
  0x2c   : > { %p2169_p10 = scmp.ne.s32.totalorder %s1637_s25, %s1633_s24  ;;  %s74_s9 = sadd.s32 1, %s1629_s23 }
  0x2d   : > { %p1831_p11 = por %p56_p8, %p2170_p7  ;;  %s2231_s17 = smov (%p41_p9, %s2229_s17), 0 }
  0x2e   : > { %2195 = sst [smem:[#allocation26_spill]] %s2231_s17  ;;  %p1843_p12 = por %p62_p1, %p2169_p10 }
  0x2f   : > { %p81_p13 = scmp.ne.s32.totalorder %s1629_s23, %s1625_s22  ;;  %s43_s18 = ssub.s32 %s1657_s30, %s2231_s17 }
  0x30   : > { %p87_p0 = scmp.ne.s32.totalorder %s1625_s22, %s1621_s21  ;;  %s45_s10 = sor.u32 %s44_s15, %s43_s18 }
  0x31   : > { %p72_p2 = scmp.eq.s32.totalorder %s43_s18, 0  ;;  %p46_p4 = scmp.eq.s32.totalorder %s45_s10, 0 }
  0x32   : > { %p1855_p5 = por %p81_p13, %p56_p8  ;;  %p1867_p6 = por %p87_p0, %p62_p1 }
  0x33   : > { %s1860_s20 = scalar_select %p72_p2, %s1629_s23, %s74_s9  }
  0x34   : > { %s1863_s3 = scalar_select %p46_p4, %s1641_s26, %s48_s11  }
  0x35   : > { %2198 = sst [smem:[#allocation27_spill]] %s1860_s20  ;;  %p197_p9 = scmp.eq.s32.totalorder %s1763_s8, 3 }
  0x36   : > { %2199 = sst [smem:[#allocation28_spill]] %s1863_s3  ;;  %p203_p10 = scmp.eq.s32.totalorder %s1083_s13, 3 }
  0x37   : > { %p1209_p7 = scmp.lt.s32.totalorder %s1661_s7, 4  ;;  %p2201_p8 = scmp.ne.s32.totalorder %s1641_s26, %s1637_s25 }
  0x38   : > { %s279_s11 = sand.u32 1, %s1641_s26   ;;  %p2203_p2 = scmp.ne.s32.totalorder %s1637_s25, %s1633_s24 }
  0x39   : > { %p1876_p13 = por %p197_p9, %p2201_p8  ;;  %s1090_s9 = sshll.u32 %s279_s11, 3 }
  0x3a   : > { %p1884_p4 = por %p203_p10, %p2203_p2  ;;  %s1091_s18 = sshll.u32 %s1657_s30, 1 }
  0x3b   : > { %s287_s13 = sadd.s32 %s1653_s29, %s1091_s18  ;;  %s283_s5 = scalar_lea.vmem [#allocation4], %s1090_s9 }
  0x3c   : > { %s2204_s15 = scalar_select %p1884_p4, 1, 0 }
  0x3d   : > { %s1092_s10 = sshll.u32 %s287_s13, 3  ;;  %s293_s17 = sshll.u32 %s283_s5, 4  ;;  %s294_s17 = int_to_ptr.vmem [resolvable:$true] %s293_s17 }
  0x3e   : > { %2205 = sst [smem:[#allocation29_spill]] %s2204_s15  ;;  %p1195_p10 = pnand %p1209_p7, %p1831_p11 }
  0x3f   : > { %s2206_s0 = sld [smem:[#allocation30_spill]]  ;;  %p1901_p0 = pnand %p1209_p7, %p1855_p5 }
  0x40   : > { %s300_s18 = sand.u32 1, %s1661_s7   ;;  %s280_s9 = scalar_lea.sflag [#allocation5], %s279_s11 }
  0x41   : > { %s302_s5 = sand.u32 1, %s1629_s23   ;;  %s1126_s13 = sshll.u32 %s1657_s30, 4 }
  0x42   : > { %s1093_s3 = sshll.u32 %s302_s5, 4  ;;  %s301_s29 = scalar_lea.sflag [#allocation8], %s300_s18 }
  0x43   : > { %s2208_s15 = smov 8   ;;  %s2209_s24 = smov 128  }
  0x45   : > { %s289_s20 = scalar_lea.hbm %s2206_s0, %s1092_s10  ;;  %s304_s0 = scalar_lea.vmem [#allocation7], %s1093_s3 }
  0x46   : > { %s291_s6 = sshll.u32 %s289_s20, 4  ;;  %s309_s20 = scalar_lea.hbm %s2161_s1, %s1126_s13  ;;  %s292_s6 = int_to_ptr.hbm [resolvable:$true] %s291_s6 }
  0x47   : > { %1197 = dma.hbm_to_vmem [thread:$0]  (!%p1195_p10), %s292_s6, 128, %s294_s17, %s280_s9  }
  0x48   : > { %s310_s14 = sshll.u32 %s309_s20, 4  ;;  %s312_s19 = sshll.u32 %s304_s0, 4  ;;  %s311_s14 = int_to_ptr.hbm [resolvable:$true] %s310_s14  ;;  %s313_s19 = int_to_ptr.vmem [resolvable:$true] %s312_s19 }
  0x49   : > { %1200 = dma.hbm_to_vmem [thread:$0]  (!%p1901_p0), %s311_s14, 256, %s313_s19, %s301_s29, %s2209_s24, %s2209_s24, %s2208_s15  }
  0x4a   : > { %324 = sbr.rel (%p1771_p3) target bundleno = 1611 (0x64b), region = 44  ;;  %s1919_s6 = sand.u32 (!%p1771_p3), 1, %s1637_s25  }
  0x4b   : > { %s1097_s17 = sshll.u32 (!%p1771_p3), %s1919_s6, 3  ;;  %s327_s11 = scalar_lea.sflag (!%p1771_p3), [#allocation5], %s1919_s6 }
  0x4c   : > { %s330_s0 = scalar_lea.vmem (!%p1771_p3), [#allocation4], %s1097_s17 }
  0x4f   : > { %1596 = dma.done.wait (%p1843_p12), %s327_s11, 128  }
  0x50   : > { %1598 = vsyncadd (%p1843_p12), %s327_s11, 4294967168  ;;  %s336_s24 = sand.u32 1, %s1763_s8   ;;  %s338_s26 = sand.u32 1, %s1625_s22  }
  0x51   : > { %s1931_s29 = sshll.u32 %s338_s26, 4  ;;  %s337_s12 = scalar_lea.sflag [#allocation8], %s336_s24 }
  0x52   : > { %s340_s15 = scalar_lea.vmem [#allocation7], %s1931_s29 }
  0x53   : > { %1600 = dma.done.wait (%p1867_p6), %s337_s12, 256  }
  0x54   : > { %1602 = vsyncadd (%p1867_p6), %s337_s12, 4294967040 }
  0x55   : > { %1604 = dma.done.wait (%p62_p1), [#allocation8], 2048  }
  0x56   : > { %1606 = vsyncadd (%p62_p1), [#allocation8], 4294965248 }
  0x57   : > { %1608 = dma.done.wait (%p62_p1), [#allocation11], 4096  }
  0x58   : > { %1610 = vsyncadd (%p62_p1), [#allocation11], 4294963200 }
  0x59   : > { %1612 = dma.done.wait (%p62_p1), [#allocation14], 2048  }
  0x5a   : > { %1614 = vsyncadd (%p62_p1), [#allocation14], 4294965248  ;;  %v1950_v0 = vld [vmem:[%s330_s0] sm:$0xff]  ;;  %v1952_v1 = vld [vmem:[#allocation9] sm:$0xff]  ;;  %s2018_s4 = scalar_lea.vmem [#allocation15], %s1097_s17  ;;  %p1104_p1 = scmp.ne.s32.totalorder %s1645_s27, 0 }
  0x5b   : > { %v1954_v2 = vld [vmem:[#allocation9 + $0x8] sm:$0xff]  ;;  %v1956_v3 = vld [vmem:[#allocation9 + $0x10] sm:$0xff]  ;;  %v1958_v4 = vld [vmem:[#allocation9 + $0x18] sm:$0xff] }
  0x5c   : > { %v1960_v5 = vld [vmem:[#allocation9 + $0x20] sm:$0xff]  ;;  %v1962_v6 = vld [vmem:[#allocation9 + $0x28] sm:$0xff]  ;;  %v1964_v7 = vld [vmem:[#allocation9 + $0x30] sm:$0xff] }
  0x5d   : > { %v1966_v8 = vld [vmem:[#allocation9 + $0x38] sm:$0xff]  ;;  %v1968_v9 = vld [vmem:[#allocation9 + $0x40] sm:$0xff]  ;;  %v1970_v10 = vld [vmem:[#allocation9 + $0x48] sm:$0xff] }
  0x5e   : > { %v1972_v11 = vld [vmem:[#allocation9 + $0x50] sm:$0xff]  ;;  %v1974_v12 = vld [vmem:[#allocation9 + $0x58] sm:$0xff]  ;;  %v1976_v13 = vld [vmem:[#allocation9 + $0x60] sm:$0xff] }
  0x5f   : > { %v1978_v14 = vld [vmem:[#allocation9 + $0x68] sm:$0xff]  ;;  %v1980_v15 = vld [vmem:[#allocation9 + $0x70] sm:$0xff]  ;;  %v1982_v16 = vld [vmem:[#allocation9 + $0x78] sm:$0xff] }
  0x60   : > { %v1984_v17 = vld [vmem:[#allocation13] sm:$0xff]  ;;  %v1986_v18 = vld [vmem:[#allocation13 + $0x8] sm:$0xff]  ;;  %v1988_v19 = vld [vmem:[#allocation13 + $0x10] sm:$0xff] }
  0x61   : > { %v1990_v20 = vld [vmem:[#allocation13 + $0x18] sm:$0xff]  ;;  %v1992_v21 = vld [vmem:[#allocation13 + $0x20] sm:$0xff]  ;;  %v1994_v22 = vld [vmem:[#allocation13 + $0x28] sm:$0xff]  ;;  %431 = sbr.rel (%p1104_p1) target bundleno = 268 (0x10c), region = 72 }
  0x62   : > { %v1996_v23 = vld [vmem:[#allocation13 + $0x30] sm:$0xff]  ;;  %v1998_v24 = vld [vmem:[#allocation13 + $0x38] sm:$0xff]  ;;  %v2000_v25 = vld [vmem:[#allocation13 + $0x40] sm:$0xff] }
  0x63   : > { %v2002_v26 = vld [vmem:[#allocation13 + $0x48] sm:$0xff]  ;;  %v2004_v27 = vld [vmem:[#allocation13 + $0x50] sm:$0xff]  ;;  %v2006_v28 = vld [vmem:[#allocation13 + $0x58] sm:$0xff] }
  0x64   : > { %v2008_v29 = vld [vmem:[#allocation13 + $0x60] sm:$0xff]  ;;  %v2010_v30 = vld [vmem:[#allocation13 + $0x68] sm:$0xff]  ;;  %v2012_v31 = vld [vmem:[#allocation13 + $0x70] sm:$0xff] }
  0x65   : > { %v2014_v32 = vld [vmem:[#allocation13 + $0x78] sm:$0xff] }
  0x66   : > { %v449_v33 = vld [vmem:[#allocation10 + $0x78] sm:$0xff]  ;;  %v448_v35 = vld [vmem:[#allocation10 + $0x70] sm:$0xff]  ;;  %v447_v37 = vld [vmem:[#allocation10 + $0x68] sm:$0xff] }
  0x67   : > { %v490_v34 = vld [vmem:[#allocation12 + $0x78] sm:$0xff]  ;;  %1127 = vmatpush.msra.mxu2 %v449_v33  ;;  %v489_v36 = vld [vmem:[#allocation12 + $0x70] sm:$0xff]  ;;  %v488_v38 = vld [vmem:[#allocation12 + $0x68] sm:$0xff]  ;;  %450 = vmatpush.msra.mxu0 %v449_v33 }
  0x68   : > { %1143 = vmatpush.msra.mxu3 %v490_v34  ;;  %491 = vmatpush.msra.mxu1 %v490_v34  ;;  %v446_v39 = vld [vmem:[#allocation10 + $0x60] sm:$0xff]  ;;  %v445_v41 = vld [vmem:[#allocation10 + $0x58] sm:$0xff]  ;;  %v444_v43 = vld [vmem:[#allocation10 + $0x50] sm:$0xff] }
  0x69   : > { %1128 = vmatpush.msra.mxu2 %v448_v35  ;;  %v487_v40 = vld [vmem:[#allocation12 + $0x60] sm:$0xff]  ;;  %451 = vmatpush.msra.mxu0 %v448_v35  ;;  %v486_v42 = vld [vmem:[#allocation12 + $0x58] sm:$0xff]  ;;  %v485_v44 = vld [vmem:[#allocation12 + $0x50] sm:$0xff] }
  0x6a   : > { %1144 = vmatpush.msra.mxu3 %v489_v36  ;;  %492 = vmatpush.msra.mxu1 %v489_v36  ;;  %v443_v45 = vld [vmem:[#allocation10 + $0x48] sm:$0xff]  ;;  %v442_v47 = vld [vmem:[#allocation10 + $0x40] sm:$0xff]  ;;  %v441_v49 = vld [vmem:[#allocation10 + $0x38] sm:$0xff] }
  0x6b   : > { %1129 = vmatpush.msra.mxu2 %v447_v37  ;;  %452 = vmatpush.msra.mxu0 %v447_v37  ;;  %v484_v46 = vld [vmem:[#allocation12 + $0x48] sm:$0xff]  ;;  %v483_v48 = vld [vmem:[#allocation12 + $0x40] sm:$0xff]  ;;  %v482_v50 = vld [vmem:[#allocation12 + $0x38] sm:$0xff] }
  0x6c   : > { %1145 = vmatpush.msra.mxu3 %v488_v38  ;;  %493 = vmatpush.msra.mxu1 %v488_v38  ;;  %v440_v51 = vld [vmem:[#allocation10 + $0x30] sm:$0xff]  ;;  %v439_v53 = vld [vmem:[#allocation10 + $0x28] sm:$0xff]  ;;  %v438_v55 = vld [vmem:[#allocation10 + $0x20] sm:$0xff] }
  0x6d   : > { %1130 = vmatpush.msra.mxu2 %v446_v39  ;;  %453 = vmatpush.msra.mxu0 %v446_v39  ;;  %v481_v52 = vld [vmem:[#allocation12 + $0x30] sm:$0xff]  ;;  %v480_v54 = vld [vmem:[#allocation12 + $0x28] sm:$0xff]  ;;  %v479_v56 = vld [vmem:[#allocation12 + $0x20] sm:$0xff] }
  0x6e   : > { %1146 = vmatpush.msra.mxu3 %v487_v40  ;;  %494 = vmatpush.msra.mxu1 %v487_v40  ;;  %v437_v57 = vld [vmem:[#allocation10 + $0x18] sm:$0xff]  ;;  %v436_v59 = vld [vmem:[#allocation10 + $0x10] sm:$0xff]  ;;  %v435_v61 = vld [vmem:[#allocation10 + $0x8] sm:$0xff] }
  0x6f   : > { %1131 = vmatpush.msra.mxu2 %v445_v41  ;;  %454 = vmatpush.msra.mxu0 %v445_v41  ;;  %v478_v58 = vld [vmem:[#allocation12 + $0x18] sm:$0xff]  ;;  %v477_v60 = vld [vmem:[#allocation12 + $0x10] sm:$0xff]  ;;  %v476_v62 = vld [vmem:[#allocation12 + $0x8] sm:$0xff] }
  0x70   : > { %1147 = vmatpush.msra.mxu3 %v486_v42  ;;  %495 = vmatpush.msra.mxu1 %v486_v42  ;;  %v434_v63 = vld [vmem:[#allocation10] sm:$0xff]  ;;  %v433_v34 = vld [vmem:[%s340_s15 + $0x8] sm:$0xff] }
  0x71   : > { %1132 = vmatpush.msra.mxu2 %v444_v43  ;;  %455 = vmatpush.msra.mxu0 %v444_v43  ;;  %v475_v33 = vld [vmem:[#allocation12] sm:$0xff] }
  0x72   : > { %1148 = vmatpush.msra.mxu3 %v485_v44  ;;  %496 = vmatpush.msra.mxu1 %v485_v44  ;;  %v432_v35 = vld [vmem:[%s340_s15] sm:$0xff] }
  0x73   : > { %1133 = vmatpush.msra.mxu2 %v443_v45  ;;  %456 = vmatpush.msra.mxu0 %v443_v45 }
  0x74   : > { %1149 = vmatpush.msra.mxu3 %v484_v46  ;;  %497 = vmatpush.msra.mxu1 %v484_v46 }
  0x75   : > { %1134 = vmatpush.msra.mxu2 %v442_v47  ;;  %457 = vmatpush.msra.mxu0 %v442_v47 }
  0x76   : > { %1150 = vmatpush.msra.mxu3 %v483_v48  ;;  %498 = vmatpush.msra.mxu1 %v483_v48 }
  0x77   : > { %1135 = vmatpush.msra.mxu2 %v441_v49  ;;  %458 = vmatpush.msra.mxu0 %v441_v49 }
  0x78   : > { %1151 = vmatpush.msra.mxu3 %v482_v50  ;;  %499 = vmatpush.msra.mxu1 %v482_v50 }
  0x79   : > { %1136 = vmatpush.msra.mxu2 %v440_v51  ;;  %459 = vmatpush.msra.mxu0 %v440_v51 }
  0x7a   : > { %1152 = vmatpush.msra.mxu3 %v481_v52  ;;  %500 = vmatpush.msra.mxu1 %v481_v52 }
  0x7b   : > { %1137 = vmatpush.msra.mxu2 %v439_v53  ;;  %460 = vmatpush.msra.mxu0 %v439_v53 }
  0x7c   : > { %1153 = vmatpush.msra.mxu3 %v480_v54  ;;  %501 = vmatpush.msra.mxu1 %v480_v54 }
  0x7d   : > { %1138 = vmatpush.msra.mxu2 %v438_v55  ;;  %461 = vmatpush.msra.mxu0 %v438_v55 }
  0x7e   : > { %1154 = vmatpush.msra.mxu3 %v479_v56  ;;  %502 = vmatpush.msra.mxu1 %v479_v56 }
  0x7f   : > { %1139 = vmatpush.msra.mxu2 %v437_v57  ;;  %462 = vmatpush.msra.mxu0 %v437_v57 }
  0x80   : > { %1155 = vmatpush.msra.mxu3 %v478_v58  ;;  %503 = vmatpush.msra.mxu1 %v478_v58 }
  0x81   : > { %1140 = vmatpush.msra.mxu2 %v436_v59  ;;  %463 = vmatpush.msra.mxu0 %v436_v59 }
  0x82   : > { %1156 = vmatpush.msra.mxu3 %v477_v60  ;;  %504 = vmatpush.msra.mxu1 %v477_v60 }
  0x83   : > { %1141 = vmatpush.msra.mxu2 %v435_v61  ;;  %464 = vmatpush.msra.mxu0 %v435_v61 }
  0x84   : > { %1157 = vmatpush.msra.mxu3 %v476_v62  ;;  %505 = vmatpush.msra.mxu1 %v476_v62 }
  0x85   : > { %1142 = vmatpush.msra.mxu2 %v434_v63  ;;  %465 = vmatpush.msra.mxu0 %v434_v63 }
  0x86   : > { %1158 = vmatpush.msra.mxu3 %v475_v33  ;;  %469 = vmatmul.f32.vlgmr.msra.gmra.mxu2 %v433_v34 }
  0x87   : > { %510 = vmatmul.f32.vlgmr.msra.gmra.mxu3 %v433_v34  ;;  %506 = vmatpush.msra.mxu1 %v475_v33 }
  0x88   : > { %466 = vmatmul.f32.vlgmr.msra.gmra.mxu0 %v432_v35  ;;  %507 = vmatmul.f32.vlgmr.msra.gmra.mxu1 %v432_v35 }
 0x105   : > { %v467_v36 = vpop.f32.mrf.mxu0  ;;  %v508_v37 = vpop.f32.mrf.mxu1 }
 0x106   : > { %473 = vst [vmem:[#allocation2] sm:$0xff] %v467_v36 }
 0x107   : > { %514 = vst [vmem:[#allocation3 + $0x8] sm:$0xff] %v508_v37 }
 0x109   : > { %v470_v38 = vpop.f32.mrf.mxu2 }
 0x10a   : > { %v511_v39 = vpop.f32.mrf.mxu3  ;;  %474 = vst [vmem:[#allocation2 + $0x8] sm:$0xff] %v470_v38 }
 0x10b   : > { %515 = vst [vmem:[#allocation3] sm:$0xff] %v511_v39 }
 0x10c PF: > { %516 = vmatpush.msra.mxu0 %v1982_v16  ;;  %vm541_vm0 = vcmask 261120   ;;  %897 = vmatpush.msra.mxu3 %v2014_v32  ;;  %s1669_s8 = smov 96   ;;  %s1670_s2 = smov 64   ;;  %vm571_vm1 = vcmask 130048  }
 0x10d   : > { %v537_v40 = vld [vmem:[#allocation2] sm:$0xff]  ;;  %s1671_s18 = smov 32   ;;  %s1122_s9 = sshll.u32 %s1649_s28, 1 }
 0x10e   : > { %622 = vrot.lane.b32.xlu1 %v537_v40, %s1669_s8  ;;  %517 = vmatpush.msra.mxu0 %v1980_v15  ;;  %s929_s5 = sadd.s32 %s1645_s27, %s1122_s9  ;;  %s2210_s10 = sld [smem:[#allocation35_spill]] }
 0x10f   : > { %898 = vmatpush.msra.mxu3 %v2012_v31  ;;  %s1123_s13 = sshll.u32 %s929_s5, 3  ;;  %s933_s14 = sshll.u32 %s2018_s4, 4  ;;  %s934_s14 = int_to_ptr.vmem [resolvable:$true] %s933_s14 }
 0x110   : > { %518 = vmatpush.msra.mxu0 %v1978_v14  ;;  %s919_s17 = scalar_lea.sflag [#allocation6], %s1919_s6 }
 0x111   : > { %v538_v41 = vld [vmem:[#allocation2 + $0x8] sm:$0xff]  ;;  %899 = vmatpush.msra.mxu3 %v2010_v30 }
 0x112   : > { %1105 = vmatpush.xpose.msk.msra.mxu1 %vm541_vm0, %v538_v41  ;;  %519 = vmatpush.msra.mxu0 %v1976_v13 }
 0x113   : > { %900 = vmatpush.msra.mxu3 %v2008_v29 }
 0x114   : > { %520 = vmatpush.msra.mxu0 %v1974_v12  ;;  %s931_s20 = scalar_lea.hbm %s2210_s10, %s1123_s13  ;;  %s1543_s24 = scalar_lea.hbm %s2210_s10, 32 }
 0x115   : > { %901 = vmatpush.msra.mxu3 %v2006_v28  ;;  %s935_s19 = sshll.u32 %s931_s20, 4  ;;  %s936_s19 = int_to_ptr.hbm [resolvable:$true] %s935_s19 }
 0x116   : > { %1106 = vmatpush.xpose.msk.msra.mxu1 %vm541_vm0, %v537_v40  ;;  %521 = vmatpush.msra.mxu0 %v1972_v11  ;;  %s1537_s11 = sshra.s32 %s936_s19, 4  ;;  %s1538_s11 = int_to_ptr.hbm [resolvable:$true] %s1537_s11 }
 0x117   : > { %902 = vmatpush.msra.mxu3 %v2004_v27  ;;  %s1539_s0 = scalar_lea.hbm %s1538_s11, 8  ;;  %p1544_p12 = scmp.lt.s32.totalorder %s1538_s11, %s2210_s10 }
 0x118   : > { %522 = vmatpush.msra.mxu0 %v1970_v10  ;;  %p1540_p3 = scmp.ne.s32.totalorder %s1538_s11, %s1539_s0  ;;  %p1545_p5 = scmp.lt.s32.totalorder %s1543_s24, %s1539_s0 }
 0x119   : > { %903 = vmatpush.msra.mxu3 %v2002_v26 }
 0x11a   : > { %523 = vmatpush.msra.mxu0 %v1968_v9  ;;  %p1541_p7 = pnand %p1540_p3, %p1876_p13  ;;  %p1546_p6 = por %p1545_p5, %p1544_p12 }
 0x11b   : > { %904 = vmatpush.msra.mxu3 %v2000_v25 }
 0x11c   : > { %524 = vmatpush.msra.mxu0 %v1966_v8  ;;  %p1542_p11 = pneg %p1541_p7 }
 0x11d   : > { %905 = vmatpush.msra.mxu3 %v1998_v24 }
 0x11e   : > { %525 = vmatpush.msra.mxu0 %v1964_v7  ;;  %p1547_p9 = pnand %p1546_p6, %p1542_p11 }
 0x11f   : > { %906 = vmatpush.msra.mxu3 %v1996_v23 }
 0x120   : > { %526 = vmatpush.msra.mxu0 %v1962_v6 }
 0x121   : > { %907 = vmatpush.msra.mxu3 %v1994_v22 }
 0x122   : > { %527 = vmatpush.msra.mxu0 %v1960_v5 }
 0x123   : > { %908 = vmatpush.msra.mxu3 %v1992_v21 }
 0x124   : > { %528 = vmatpush.msra.mxu0 %v1958_v4 }
 0x125   : > { %909 = vmatpush.msra.mxu3 %v1990_v20 }
 0x126   : > { %529 = vmatpush.msra.mxu0 %v1956_v3  ;;  %v539_v3 = vld [vmem:[#allocation3 + $0x8] sm:$0xff] }
 0x127   : > { %910 = vmatpush.msra.mxu3 %v1988_v19 }
 0x128   : > { %530 = vmatpush.msra.mxu0 %v1954_v2 }
 0x129   : > { %911 = vmatpush.msra.mxu3 %v1986_v18 }
 0x12a   : > { %531 = vmatpush.msra.mxu0 %v1952_v1 }
 0x12b   : > { %912 = vmatpush.msra.mxu3 %v1984_v17  ;;  %532 = vmatmul.f32.vlgmr.msra.gmra.mxu0 %v1950_v0  ;;  %v540_v0 = vld [vmem:[#allocation3] sm:$0xff] }
 0x12c   : > { %598 = vmatpush.msra.mxu2 %v540_v0  ;;  %v1312_v9 = vpack.i.bf16 %v539_v3, %v540_v0 }
 0x12e   : > { %599 = vmatpush.msra.mxu2 %v539_v3  ;;  %1313 = vrot.lane.b32.xlu2 %v1312_v9, %s1669_s8 }
 0x180   : > { %v623_v11 = vpop.permute.xlu1 %622 }
 0x188   : > { %v1314_v15 = vpop.permute.xlu2 %1313 }
 0x189   : > { %v1316_v17 = vunpack.i.h.bf16 %v1314_v15  ;;  %v1315_v18 = vunpack.i.l.bf16 %v1314_v15 }
 0x1a8   : > { %v533_v5 = vpop.f32.mrf.mxu0 }
 0x1a9   : > { %v536_v6 = vmul.f32 0.17677669, %v533_v5 }
 0x1ab   : > { %620 = vrot.lane.b32.xlu1 %v536_v6, %s1669_s8  ;;  %1107 = vmatmul.msk.f32.vlgmr.msra.gmra.mxu1 %vm541_vm0, %v536_v6 }
 0x1b3   : > { %712 = vrot.lane.b32.xlu1 %v538_v41, %s1670_s2 }
 0x1bb   : > { %798 = vrot.lane.b32.xlu1 %v538_v41, %s1671_s18 }
 0x1c3   : > { %796 = vrot.lane.b32.xlu1 %v537_v40, %s1671_s18 }
 0x21d   : > { %v621_v13 = vpop.permute.xlu1 %620 }
 0x225   : > { %v713_v16 = vpop.permute.xlu1 %712 }
 0x226   : > { %1113 = vmatpush.xpose.msk.msrb.mxu1 %vm541_vm0, %v713_v16 }
 0x228   : > { %v568_v1 = vpop.f32.mrf.mxu1 }
 0x229   : > { %v572_v2 = vsel %vm571_vm1, %v568_v1, -inf }
 0x22a   : > { %573 = vmax.xlane.f32.xlu0 %v572_v2 }
 0x22d   : > { %v799_v22 = vpop.permute.xlu1 %798 }
 0x235   : > { %v797_v23 = vpop.permute.xlu1 %796 }
 0x23e   : > { %624 = vrot.lane.b32.xlu0 %v538_v41, %s1669_s8 }
 0x246   : > { %710 = vrot.lane.b32.xlu0 %v537_v40, %s1670_s2 }
 0x24e   : > { %794 = vrot.lane.b32.xlu0 %v536_v6, %s1671_s18 }
 0x256   : > { %1318 = vrot.lane.b32.xlu0 %v1312_v9, %s1670_s2 }
 0x25e   : > { %1323 = vrot.lane.b32.xlu0 %v1312_v9, %s1671_s18 }
 0x29d   : > { %v574_v4 = vpop.xlane.xlu0 %573 }
 0x29e   : > { %v575_v7 = vsub.f32 %v568_v1, %v574_v4 }
 0x2a0   : > { %v576_v8 = vmul.f32 1.442695, %v575_v7 }
 0x2a2   : > { %1327 = vpow2.f32 %v576_v8 }
 0x2a8   : > { %v2071_v10 = vpop.eup %1327 }
 0x2a9   : > { %1108 = vmatmul.msk.f32.vlgmr.msra.gmra.mxu2 %vm571_vm1, %v2071_v10  ;;  %v578_v60 = vsel %vm571_vm1, %v2071_v10, 0.0 }
 0x2b0   : > { %v625_v12 = vpop.permute.xlu0 %624 }
 0x2b1   : > { %1109 = vmatpush.xpose.msk.msrb.mxu2 %vm541_vm0, %v625_v12 }
 0x2b5   : > { %1110 = vmatpush.xpose.msk.msrb.mxu2 %vm541_vm0, %v623_v11 }
 0x2b8   : > { %1111 = vmatmul.msk.f32.vlgmr.msrb.gmra.mxu2 %vm541_vm0, %v621_v13  ;;  %v711_v19 = vpop.permute.xlu0 %710 }
 0x2b9   : > { %686 = vmatpush.msra.mxu2 %v1315_v18  ;;  %1114 = vmatpush.xpose.msk.msrb.mxu1 %vm541_vm0, %v711_v19 }
 0x2bb   : > { %687 = vmatpush.msra.mxu2 %v1316_v17 }
 0x2bd   : > { %1117 = vmatpush.xpose.msk.msrb.mxu2 %vm541_vm0, %v799_v22 }
 0x2c0   : > { %v795_v24 = vpop.permute.xlu0 %794 }
 0x2c1   : > { %1118 = vmatpush.xpose.msk.msrb.mxu2 %vm541_vm0, %v797_v23 }
 0x2c8   : > { %v1319_v25 = vpop.permute.xlu0 %1318 }
 0x2c9   : > { %v1321_v26 = vunpack.i.h.bf16 %v1319_v25  ;;  %v1320_v27 = vunpack.i.l.bf16 %v1319_v25 }
 0x2cb   : > { %772 = vmatpush.msra.mxu1 %v1320_v27 }
 0x2cd   : > { %773 = vmatpush.msra.mxu1 %v1321_v26 }
 0x2d0   : > { %v1324_v31 = vpop.permute.xlu0 %1323 }
 0x2d1   : > { %v1325_v32 = vunpack.i.l.bf16 %v1324_v31  ;;  %v1326_v43 = vunpack.i.h.bf16 %v1324_v31 }
 0x32c   : > { %v2078_v14 = vpop.f32.mrf.mxu2 }
 0x33b   : > { %v649_v20 = vpop.f32.mrf.mxu2 }
 0x33c   : > { %v652_v21 = vsel %vm571_vm1, %v649_v20, -inf }
 0x33d   : > { %653 = vmax.xlane.f32.xlu2 %v652_v21 }
 0x355   : > { %708 = vrot.lane.b32.xlu2 %v536_v6, %s1670_s2 }
 0x3b0   : > { %v654_v28 = vpop.xlane.xlu2 %653 }
 0x3b1   : > { %v655_v29 = vsub.f32 %v649_v20, %v654_v28 }
 0x3b3   : > { %v656_v30 = vmul.f32 1.442695, %v655_v29 }
 0x3b5   : > { %1329 = vpow2.f32 %v656_v30 }
 0x3b8   : > { %v709_v42 = vpop.permute.xlu2 %708 }
 0x3b9   : > { %1115 = vmatmul.msk.f32.vlgmr.msrb.gmra.mxu1 %vm541_vm0, %v709_v42 }
 0x3ba   : > { %858 = vmatpush.msrb.mxu1 %v1325_v32 }
 0x3bb   : > { %v1330_v44 = vpop.eup %1329 }
 0x3bc   : > { %1112 = vmatmul.msk.f32.vlgmr.msra.gmra.mxu2 %vm571_vm1, %v1330_v44  ;;  %v658_v45 = vsel %vm571_vm1, %v1330_v44, 0.0  ;;  %859 = vmatpush.msrb.mxu1 %v1326_v43 }
 0x3bd   : > { %659 = vadd.xlane.f32.xlu0 %v658_v45 }
 0x3c4   : > { %1119 = vmatmul.msk.f32.vlgmr.msrb.gmra.mxu2 %vm541_vm0, %v795_v24 }
 0x430   : > { %v660_v57 = vpop.xlane.xlu0 %659 }
 0x431   : > { %v703_v37 = vand.u32 2147483648, %v660_v57  ;;  %vm697_vm3 = vweird.f32 %v660_v57  ;;  %v701_v38 = vand.u32 2147483647, %v660_v57 }
 0x433   : > { %v704_v40 = vor.u32 1.1754944e-38, %v703_v37  ;;  %vm702_vm5 = vcmp.eq.f32.partialorder %v701_v38, 8.507059e+37 }
 0x436   : > { %v737_v46 = vpop.f32.mrf.mxu1 }
 0x437   : > { %v740_v47 = vsel %vm571_vm1, %v737_v46, -inf }
 0x438   : > { %741 = vmax.xlane.f32.xlu1 %v740_v47 }
 0x43f   : > { %v689_v48 = vpop.f32.mrf.mxu2 }
 0x447   : > { %v823_v49 = vpop.f32.mrf.mxu2 }
 0x448   : > { %v826_v50 = vsel %vm571_vm1, %v823_v49, -inf }
 0x449   : > { %827 = vmax.xlane.f32.xlu2 %v826_v50 }
 0x4ab   : > { %v742_v51 = vpop.xlane.xlu1 %741 }
 0x4ac   : > { %v743_v52 = vsub.f32 %v737_v46, %v742_v51 }
 0x4ae   : > { %v744_v53 = vmul.f32 1.442695, %v743_v52 }
 0x4b0   : > { %1331 = vpow2.f32 %v744_v53 }
 0x4b1   : > { %1333 = vrcp.f32 %v660_v57 }
 0x4b6   : > { %v1332_v54 = vpop.eup %1331 }
 0x4b7   : > { %1116 = vmatmul.msk.f32.vlgmr.msra.gmra.mxu1 %vm571_vm1, %v1332_v54  ;;  %v746_v55 = vsel %vm571_vm1, %v1332_v54, 0.0  ;;  %v1334_v61 = vpop.eup %1333 }
 0x4b8   : > { %747 = vadd.xlane.f32.xlu2 %v746_v55  ;;  %v693_v33 = vmul.f32 %v1334_v61, %v660_v57  ;;  %vm698_vm2 = vweird.f32 %v1334_v61 }
 0x4b9   : > { %vm699_vm4 = vmor %vm697_vm3, %vm698_vm2  ;;  %vm893_vm3 = vcmask 523264  }
 0x4ba   : > { %v694_v34 = vsub.f32 1.0, %v693_v33 }
 0x4bc   : > { %v828_v56 = vpop.xlane.xlu2 %827  ;;  %v695_v35 = vmul.f32 %v1334_v61, %v694_v34 }
 0x4bd   : > { %v829_v58 = vsub.f32 %v823_v49, %v828_v56 }
 0x4be   : > { %v696_v36 = vadd.f32 %v1334_v61, %v695_v35 }
 0x4bf   : > { %v830_v59 = vmul.f32 1.442695, %v829_v58 }
 0x4c0   : > { %579 = vadd.xlane.f32.xlu2 %v578_v60  ;;  %v700_v39 = vsel %vm699_vm4, %v1334_v61, %v696_v36  ;;  %vm895_vm4 = vcmask 785408  }
 0x4c1   : > { %1335 = vpow2.f32 %v830_v59  ;;  %v705_v41 = vsel %vm702_vm5, %v704_v40, %v700_v39 }
 0x4c2   : > { %v707_v5 = vmul.f32 %v705_v41, %v689_v48 }
 0x4c7   : > { %v1336_v62 = vpop.eup %1335 }
 0x4c8   : > { %1120 = vmatmul.msk.f32.vlgmr.msrb.gmra.mxu1 %vm571_vm1, %v1336_v62  ;;  %v832_v63 = vsel %vm571_vm1, %v1336_v62, 0.0 }
 0x4c9   : > { %833 = vadd.xlane.f32.xlu1 %v832_v63 }
 0x4e2   : > { %881 = vrot.lane.b32.xlu1 %v707_v5, %s1671_s18 }
 0x52b   : > { %v748_v6 = vpop.xlane.xlu2 %747 }
 0x52c   : > { %1337 = vrcp.f32 %v748_v6  ;;  %v789_v3 = vand.u32 2147483648, %v748_v6  ;;  %v787_v7 = vand.u32 2147483647, %v748_v6  ;;  %vm783_vm7 = vweird.f32 %v748_v6 }
 0x52e   : > { %v790_v9 = vor.u32 1.1754944e-38, %v789_v3  ;;  %vm788_vm9 = vcmp.eq.f32.partialorder %v787_v7, 8.507059e+37 }
 0x532   : > { %v1338_v1 = vpop.eup %1337 }
 0x533   : > { %v779_v2 = vmul.f32 %v1338_v1, %v748_v6  ;;  %vm784_vm6 = vweird.f32 %v1338_v1  ;;  %v580_v28 = vpop.xlane.xlu2 %579 }
 0x534   : > { %vm785_vm8 = vmor %vm783_vm7, %vm784_vm6  ;;  %v775_v11 = vpop.f32.mrf.mxu1  ;;  %v615_v43 = vand.u32 2147483648, %v580_v28  ;;  %vm609_vm15 = vweird.f32 %v580_v28  ;;  %v613_v44 = vand.u32 2147483647, %v580_v28 }
 0x535   : > { %v780_v0 = vsub.f32 1.0, %v779_v2 }
 0x536   : > { %v616_v46 = vor.u32 1.1754944e-38, %v615_v43  ;;  %vm614_vm2 = vcmp.eq.f32.partialorder %v613_v44, 8.507059e+37 }
 0x537   : > { %v781_v4 = vmul.f32 %v1338_v1, %v780_v0 }
 0x539   : > { %v782_v8 = vadd.f32 %v1338_v1, %v781_v4 }
 0x53b   : > { %v786_v10 = vsel %vm785_vm8, %v1338_v1, %v782_v8 }
 0x53c   : > { %v791_v12 = vsel %vm788_vm9, %v790_v9, %v786_v10  ;;  %v834_v13 = vpop.xlane.xlu1 %833 }
 0x53d   : > { %v793_v15 = vmul.f32 %v791_v12, %v775_v11  ;;  %1339 = vrcp.f32 %v834_v13  ;;  %v875_v19 = vand.u32 2147483648, %v834_v13  ;;  %v873_v21 = vand.u32 2147483647, %v834_v13 }
 0x53e   : > { %vm869_vm11 = vweird.f32 %v834_v13  ;;  %1341 = vrcp.f32 %v580_v28 }
 0x53f   : > { %885 = vrot.lane.b32.xlu2 %v793_v15, %s1670_s2  ;;  %v876_v23 = vor.u32 1.1754944e-38, %v875_v19  ;;  %vm874_vm13 = vcmp.eq.f32.partialorder %v873_v21, 8.507059e+37 }
 0x543   : > { %v1340_v16 = vpop.eup %1339 }
 0x544   : > { %v865_v17 = vmul.f32 %v1340_v16, %v834_v13  ;;  %vm870_vm10 = vweird.f32 %v1340_v16  ;;  %v1342_v29 = vpop.eup %1341 }
 0x545   : > { %vm871_vm12 = vmor %vm869_vm11, %vm870_vm10  ;;  %v861_v25 = vpop.f32.mrf.mxu1  ;;  %v605_v30 = vmul.f32 %v1342_v29, %v580_v28  ;;  %vm610_vm14 = vweird.f32 %v1342_v29 }
 0x546   : > { %v866_v18 = vsub.f32 1.0, %v865_v17  ;;  %vm611_vm1 = vmor %vm609_vm15, %vm610_vm14 }
 0x547   : > { %v606_v31 = vsub.f32 1.0, %v605_v30 }
 0x548   : > { %v867_v20 = vmul.f32 %v1340_v16, %v866_v18 }
 0x549   : > { %v607_v32 = vmul.f32 %v1342_v29, %v606_v31 }
 0x54a   : > { %v868_v22 = vadd.f32 %v1340_v16, %v867_v20 }
 0x54b   : > { %v608_v42 = vadd.f32 %v1342_v29, %v607_v32 }
 0x54c   : > { %v872_v24 = vsel %vm871_vm12, %v1340_v16, %v868_v22 }
 0x54d   : > { %v877_v26 = vsel %vm874_vm13, %v876_v23, %v872_v24  ;;  %v612_v45 = vsel %vm611_vm1, %v1342_v29, %v608_v42 }
 0x54e   : > { %v879_v27 = vmul.f32 %v877_v26, %v861_v25  ;;  %v617_v47 = vsel %vm614_vm2, %v616_v46, %v612_v45 }
 0x54f   : > { %v619_v49 = vmul.f32 %v617_v47, %v2078_v14 }
 0x550   : > { %889 = vrot.lane.b32.xlu0 %v879_v27, %s1669_s8 }
 0x554   : > { %v882_v48 = vpop.permute.xlu1 %881 }
 0x555   : > { %v892_v51 = vsel %vm541_vm0, %v619_v49, %v882_v48 }
 0x599   : > { %v886_v50 = vpop.permute.xlu2 %885 }
 0x59a   : > { %v894_v52 = vsel %vm893_vm3, %v892_v51, %v886_v50 }
 0x5c2   : > { %v890_v53 = vpop.permute.xlu0 %889 }
 0x5c3   : > { %v896_v54 = vsel %vm895_vm4, %v894_v52, %v890_v53 }
 0x5c4   : > { %913 = vmatmul.f32.vlgmr.msra.gmra.mxu3 %v896_v54 }
 0x647   : > { %v914_v14 = vpop.f32.mrf.mxu3 }
 0x648   : > { %917 = vst [vmem:[%s2018_s4] sm:$0xff] %v914_v14 }
 0x649   : > { %1550 = shalt.err (!%p1547_p9)
}
 0x64a   : > { %1179 = dma.vmem_to_hbm [thread:$0]  (%p1876_p13), %s934_s14, 128, %s936_s19, %s919_s17  }
 0x64b PF: > { %s2211_s6 = sld [smem:[#allocation22_spill]]  ;;  %p1214_p8 = scmp.ge.s32.totalorder %s1661_s7, 2 }
 0x64d   : > { %p1202_p2 = pnand %p1214_p8, %p1884_p4 }
 0x64f   : > { %p1203_p10 = pneg %p1202_p2 }
 0x651   : > { %s947_s15 = sand.u32 1, %s2211_s6  }
 0x652   : > { %s948_s4 = scalar_lea.sflag [#allocation6], %s947_s15 }
 0x653   : > { %1616 = dma.done.wait (%p1203_p10), %s948_s4, 128  }
 0x654   : > { %1618 = vsyncadd (%p1203_p10), %s948_s4, 4294967168  ;;  %s27_s7 = sadd.s32 1, %s1661_s7   ;;  %s2213_s8 = sld [smem:[#allocation27_spill]] }
 0x655   : > { %p24_p0 = scmp.ge.s32.totalorder %s27_s7, 6   ;;  %s2214_s2 = sld [smem:[#allocation23_spill]] }
 0x656   : > { %s2215_s26 = sld [smem:[#allocation28_spill]]  ;;  %s2219_s21 = smov %s1625_s22 }
 0x657   : > { %s2216_s27 = sld [smem:[#allocation24_spill]]  ;;  %s2220_s22 = smov %s1629_s23 }
 0x658   : > { %s2217_s29 = sld [smem:[#allocation25_spill]]  ;;  %s2222_s24 = smov %s1637_s25 }
 0x659   : > { %s2218_s18 = sld [smem:[#allocation26_spill]]  ;;  %s2224_s28 = smov %s1657_s30 }
 0x65a   : > { %s2221_s23 = smov %s2213_s8 }
 0x65b   : > { %s2223_s25 = smov %s2214_s2  ;;  %26 = sbr.rel (!%p24_p0) target bundleno = 20 (0x14), region = 122 }
 0x65f   : > { %s2225_s30 = smov %s2218_s18 }
 0x660   :  { %954 = vsyncpa [#allocation5], 1 }
 0x661   :  { %956 = vsyncpa [#allocation5 + $0x1], 1 }
 0x662   :  { %957 = vsyncpa [#allocation8], 1 }
 0x663   :  { %959 = vsyncpa [#allocation8 + $0x1], 1 }
 0x664   :  { %960 = vsyncpa [#allocation11], 1 }
 0x665   :  { %961 = vsyncpa [#allocation14], 1 }
 0x666   :  { %962 = vsyncpa [#allocation6], 1 }
 0x667   :  { %964 = vsyncpa [#allocation6 + $0x1], 1 }

</bundles_post_ra>
